<compile_context>
chip_gen: v7x
topology: tpu7x:2x2x1
jax: 0.10.0
libtpu: 0.0.40
codegen_flags: <defaults>
</compile_context>

<pallas_src>
import functools

import numpy as np
import jax
import jax.numpy as jnp
from jax.experimental import pallas as pl
from jax.experimental.pallas import tpu as pltpu

# ----------------------------- model config ---------------------------------
INPUT_DIM = 3
DIST_DIM = 2
STATE_DIM = 4
HIDDEN_DIM = 32            # multiple of 8 (sublane alignment of the slab)
OUTPUT_DIM = 2
N_HID_LAYERS = 2           # -> one extra (hidden, hidden) layer in f_hid
BATCH = 16

LANES = 128                # lane-dense width for weight slab / output slab
K1_ROWS = 16               # stage-1 rows: [x(4), u(3), d(2), ones(1), pad(6)]

# Column layout of the 128-wide intermediate / output slab.
#   dx (x_lin + bf + Wf h) : lanes [0, S)
#   y  (y_lin)             : lanes [S, S+O)
#   fx pre-activation      : lanes [COL_FX, COL_FX+H)   (internal scratch only)
COL_DX = 0
COL_Y = STATE_DIM
COL_FX = 32                                    # 8-aligned, clear of dx/y lanes
assert COL_Y + OUTPUT_DIM <= COL_FX
assert COL_FX + HIDDEN_DIM <= LANES


# ------------------------------- kernel -------------------------------------
def _grnssm_kernel(act_ref, w_ref, out_ref, *, hidden_dim, n_hid_layers,
                   k1_rows, col_fx):
    f32 = jnp.float32
    act = act_ref[...]                                        # (Bp, 16)

    # Fused stage 1: one MXU push computes fx_preact, x_lin (+bf), y_lin.
    z1 = jnp.dot(act, w_ref[0:k1_rows, :],
                 preferred_element_type=f32)                  # (Bp, 128)

    # Nonlinear residual.
    h = jnp.tanh(z1[:, col_fx:col_fx + hidden_dim])           # (Bp, H)
    for k in range(n_hid_layers - 1):                         # static unroll
        r0 = k1_rows + hidden_dim * k
        h = jnp.tanh(
            jnp.dot(h, w_ref[r0:r0 + hidden_dim, col_fx:col_fx + hidden_dim],
                    preferred_element_type=f32))

    # Final projection: full 128-lane matmul (only the dx lanes of the weight
    # block are nonzero); keeps the store lane-dense / unmasked.
    r2 = k1_rows + hidden_dim * (n_hid_layers - 1)
    out_ref[...] = z1 + jnp.dot(h, w_ref[r2:r2 + hidden_dim, :],
                                preferred_element_type=f32)
    # Lanes [col_fx, col_fx+H) of the output hold fx_preact garbage; the
    # wrapper only reads lanes [0, S+O).


# ---------------------------- weight packing ---------------------------------
def pack_weight_slab(params, n_hid_layers):
    """Pack all weights/biases into one (16 + H*n_hid_layers, 128) f32 slab.

    Host-side (numpy), intended to be called ONCE at parameter-init time; the
    returned device array is reused across all forward calls.
    """
    H, S, O = HIDDEN_DIM, STATE_DIM, OUTPUT_DIM
    I, D = INPUT_DIM, DIST_DIM
    G = I + D
    assert S + G + 1 <= K1_ROWS
    assert H % 8 == 0 and K1_ROWS % 8 == 0

    n_extra = n_hid_layers - 1
    rows = K1_ROWS + H * n_extra + H
    assert rows % 8 == 0
    W = np.zeros((rows, LANES), np.float32)

    A = np.asarray(params["A"], np.float32)
    B = np.asarray(params["B"], np.float32)
    C = np.asarray(params["C"], np.float32)
    Wfx_w = np.asarray(params["Wfx_w"], np.float32)
    Wfx_b = np.asarray(params["Wfx_b"], np.float32)
    Wfu_w = np.asarray(params["Wfu_w"], np.float32)
    Wfd_w = np.asarray(params["Wfd_w"], np.float32)
    Wf_w = np.asarray(params["Wf_w"], np.float32)
    Wf_b = np.asarray(params["Wf_b"], np.float32)
    Bt = B.T                                                  # (G, S)

    # --- stage 1: rows 0:K1_ROWS, act layout [x | u | d | 1 | pad] ---
    W[0:S, COL_DX:COL_DX + S] = A.T                           # x -> x_lin
    W[0:S, COL_Y:COL_Y + O] = C.T                             # x -> y_lin
    W[0:S, COL_FX:COL_FX + H] = Wfx_w.T                       # x -> fx
    W[S:S + I, COL_DX:COL_DX + S] = Bt[0:I, :]                # u -> x_lin
    W[S:S + I, COL_FX:COL_FX + H] = Wfu_w.T                   # u -> fx
    W[S + I:S + G, COL_DX:COL_DX + S] = Bt[I:G, :]            # d -> x_lin
    W[S + I:S + G, COL_FX:COL_FX + H] = Wfd_w.T               # d -> fx
    # ones row: both biases folded into the single stage-1 matmul.
    W[S + G, COL_DX:COL_DX + S] = Wf_b                        # bf
    W[S + G, COL_FX:COL_FX + H] = Wfx_b                       # bfx

    # --- extra hidden layers: H rows each, cols [COL_FX, COL_FX+H) ---
    for k, hw in enumerate(params["hid_ws"]):
        r0 = K1_ROWS + H * k
        W[r0:r0 + H, COL_FX:COL_FX + H] = np.asarray(hw, np.float32).T

    # --- final projection Wf^T: lands in the dx lanes ---
    r2 = K1_ROWS + H * n_extra
    W[r2:r2 + H, COL_DX:COL_DX + S] = Wf_w.T
    return jnp.asarray(W)


# ------------------------------ wrapper --------------------------------------
@jax.jit
def grnssm_dist_forward(inp, x, w_slab):
    """inp: (B, input_dim + dist_dim), x: (B, state_dim), w_slab: packed slab.

    Returns (dx, y). jit-compiled: activation assembly + output slicing fuse
    around the single pallas_call.
    """
    B = inp.shape[0]
    Bp = max(8, ((B + 7) // 8) * 8)                # pad batch to sublane multiple
    S, O, G = STATE_DIM, OUTPUT_DIM, inp.shape[1]

    # Activation slab [x | u | d | 1 | zero-pad] -> (Bp, 16).
    act = jnp.concatenate(
        [x.astype(jnp.float32), inp.astype(jnp.float32),
         jnp.ones((B, 1), jnp.float32),
         jnp.zeros((B, K1_ROWS - (S + G + 1)), jnp.float32)], axis=1)
    if Bp != B:
        act = jnp.pad(act, ((0, Bp - B), (0, 0)))

    kernel = functools.partial(
        _grnssm_kernel, hidden_dim=HIDDEN_DIM, n_hid_layers=N_HID_LAYERS,
        k1_rows=K1_ROWS, col_fx=COL_FX)

    vmem = pltpu.MemorySpace.VMEM
    out = pl.pallas_call(
        kernel,
        out_shape=jax.ShapeDtypeStruct((Bp, LANES), jnp.float32),
        in_specs=[pl.BlockSpec(memory_space=vmem),     # activation slab
                  pl.BlockSpec(memory_space=vmem)],    # packed weight slab
        out_specs=pl.BlockSpec(memory_space=vmem),     # lane-dense output slab
    )(act, w_slab)

    # Single contiguous lane-0-aligned read-back, then split.
    dxy = out[:B, COL_DX:COL_Y + OUTPUT_DIM]           # (B, S+O)
    dx = dxy[:, :STATE_DIM]
    y = dxy[:, STATE_DIM:STATE_DIM + OUTPUT_DIM]
    return dx, y


# --------------------------- reference (pure JAX) -----------------------------
def grnssm_dist_reference(inp, x, params):
    u = inp[:, :INPUT_DIM]
    d = inp[:, INPUT_DIM:INPUT_DIM + DIST_DIM]
    x_lin = x @ params["A"].T + inp @ params["B"].T
    y_lin = x @ params["C"].T
    fx = (x @ params["Wfx_w"].T + params["Wfx_b"]
          + u @ params["Wfu_w"].T + d @ params["Wfd_w"].T)
    fx = jnp.tanh(fx)
    for w in params["hid_ws"]:
        fx = jnp.tanh(fx @ w.T)
    fx = fx @ params["Wf_w"].T + params["Wf_b"]
    return x_lin + fx, y_lin


# ------------------------------- main -----------------------------------------
if __name__ == "__main__":
    key = jax.random.PRNGKey(0)
    ks = jax.random.split(key, 16)

    gdim = INPUT_DIM + DIST_DIM
    # Deterministic synthetic parameters (PyTorch nn.Linear layout: (out, in)).
    params = {
        "A": 0.1 * jax.random.normal(ks[0], (STATE_DIM, STATE_DIM), jnp.float32),
        "B": 0.1 * jax.random.normal(ks[1], (STATE_DIM, gdim), jnp.float32),
        "C": 0.1 * jax.random.normal(ks[2], (OUTPUT_DIM, STATE_DIM), jnp.float32),
        "Wfx_w": 0.1 * jax.random.normal(ks[3], (HIDDEN_DIM, STATE_DIM), jnp.float32),
        "Wfx_b": 0.1 * jax.random.normal(ks[4], (HIDDEN_DIM,), jnp.float32),
        "Wfu_w": 0.1 * jax.random.normal(ks[5], (HIDDEN_DIM, INPUT_DIM), jnp.float32),
        "Wfd_w": 0.1 * jax.random.normal(ks[6], (HIDDEN_DIM, DIST_DIM), jnp.float32),
        "hid_ws": [0.1 * jax.random.normal(ks[7 + k], (HIDDEN_DIM, HIDDEN_DIM),
                                           jnp.float32)
                   for k in range(N_HID_LAYERS - 1)],
        "Wf_w": 0.1 * jax.random.normal(ks[10], (STATE_DIM, HIDDEN_DIM), jnp.float32),
        "Wf_b": 0.1 * jax.random.normal(ks[11], (STATE_DIM,), jnp.float32),
    }

    # Pack the weight slab ONCE (init-time, host-side); reused every call.
    w_slab = pack_weight_slab(params, N_HID_LAYERS)
    w_slab = jax.block_until_ready(w_slab)

    inp = jax.random.normal(ks[12], (BATCH, gdim), jnp.float32)   # [u, d]
    x = jax.random.normal(ks[13], (BATCH, STATE_DIM), jnp.float32)

    dx, y = grnssm_dist_forward(inp, x, w_slab)
    dx = jax.block_until_ready(dx)
    y = jax.block_until_ready(y)

    dx_ref, y_ref = grnssm_dist_reference(inp, x, params)
    assert dx.shape == (BATCH, STATE_DIM) and y.shape == (BATCH, OUTPUT_DIM)
    assert jnp.allclose(dx, dx_ref, atol=1e-4, rtol=1e-4)
    assert jnp.allclose(y, y_ref, atol=1e-4, rtol=1e-4)

    print("KERNEL_OK")
</pallas_src>

<mosaic_0001>
module attributes {stable_mosaic.version = 11 : i64} {
  func.func @_grnssm_kernel(%arg0: memref<16x16xf32, #tpu.memory_space<vmem>>, %arg1: memref<80x128xf32, #tpu.memory_space<vmem>>, %arg2: memref<16x128xf32, #tpu.memory_space<vmem>>) attributes {dimension_semantics = [], scalar_prefetch = 0 : i64, scratch_operands = 0 : i64, tpu.core_type = #tpu.core_type<tc>} {
    %c0 = arith.constant 0 : index
    %c0_0 = arith.constant 0 : index
    %0 = vector.load %arg0[%c0, %c0_0] : memref<16x16xf32, #tpu.memory_space<vmem>>, vector<16x16xf32>
    %c0_1 = arith.constant 0 : index
    %c0_2 = arith.constant 0 : index
    %1 = vector.load %arg1[%c0_1, %c0_2] : memref<80x128xf32, #tpu.memory_space<vmem>>, vector<16x128xf32>
    %cst = arith.constant dense<0.000000e+00> : vector<16x128xf32>
    %2 = tpu.matmul %0, %1, %cst {dimension_numbers = #tpu.dot_dimension_numbers<[1], [0], [0], [1], [0, 0, 1, 1], [], []>} : vector<16x16xf32>, vector<16x128xf32>, vector<16x128xf32> -> vector<16x128xf32>
    %3 = vector.extract_strided_slice %2 {offsets = [0, 32], sizes = [16, 32], strides = [1, 1]} : vector<16x128xf32> to vector<16x32xf32>
    %4 = math.tanh %3 : vector<16x32xf32>
    %c16 = arith.constant 16 : index
    %c32 = arith.constant 32 : index
    %5 = vector.load %arg1[%c16, %c32] : memref<80x128xf32, #tpu.memory_space<vmem>>, vector<32x32xf32>
    %cst_3 = arith.constant dense<0.000000e+00> : vector<16x32xf32>
    %6 = tpu.matmul %4, %5, %cst_3 {dimension_numbers = #tpu.dot_dimension_numbers<[1], [0], [0], [1], [0, 0, 1, 1], [], []>} : vector<16x32xf32>, vector<32x32xf32>, vector<16x32xf32> -> vector<16x32xf32>
    %7 = math.tanh %6 : vector<16x32xf32>
    %c48 = arith.constant 48 : index
    %c0_4 = arith.constant 0 : index
    %8 = vector.load %arg1[%c48, %c0_4] : memref<80x128xf32, #tpu.memory_space<vmem>>, vector<32x128xf32>
    %cst_5 = arith.constant dense<0.000000e+00> : vector<16x128xf32>
    %9 = tpu.matmul %7, %8, %cst_5 {dimension_numbers = #tpu.dot_dimension_numbers<[1], [0], [0], [1], [0, 0, 1, 1], [], []>} : vector<16x32xf32>, vector<32x128xf32>, vector<16x128xf32> -> vector<16x128xf32>
    %10 = arith.addf %2, %9 : vector<16x128xf32>
    %c0_6 = arith.constant 0 : index
    %c0_7 = arith.constant 0 : index
    %11 = vector.load %arg2[%c0_6, %c0_7] : memref<16x128xf32, #tpu.memory_space<vmem>>, vector<16x128xf32>
    tpu.vector_store %arg2[%c0_6, %c0_7], %10 {strides = array<i32>} : memref<16x128xf32, #tpu.memory_space<vmem>>, vector<16x128xf32>,
    return
  }
}

</mosaic_0001>

<bundles_post_ra>
// kernel: grnssm_dist_forward.1
= control target key start
LH: loop header
LB: loop body
LE: loop exit
PB: predicated region body
PF: predicated region fallthrough
CT: control target
= control target key end

     0   :  { %vm15_vm0 = vcmask 130048   ;;  %s390_s25 = smov 96   ;;  %vm125_vm1 = vcmask 261120   ;;  %s452_s1 = inlined_call_operand.vmem [shape: f32[80,128], index: 1, kind: input, shape index: {}]   ;;  %s453_s0 = inlined_call_operand.vmem [shape: f32[16,16], index: 0, kind: input, shape index: {}]   ;;  %s454_s2 = inlined_call_operand.vmem [shape: f32[16,128], index: 2, kind: output, shape index: {}]  }
   0x1   :  { %v13_v0 = vld [vmem:[%s452_s1] sm:$0xff]  ;;  %v14_v1 = vld [vmem:[%s452_s1 + $0x8] sm:$0xff]  ;;  %v99_v5 = vld [vmem:[%s452_s1 + $0x10] sm:$0xff] }
   0x2   :  { %v11_v2 = vld [vmem:[%s453_s0] sm:$0xff]  ;;  %v351_v3 = vpack.c.bf16 %v14_v1, %v13_v0  ;;  %v12_v4 = vld [vmem:[%s453_s0 + $0x8] sm:$0xff]  ;;  %v100_v6 = vld [vmem:[%s452_s1 + $0x18] sm:$0xff] }
   0x3   :  { %326 = vmatprep.mubr.msk.f32.mxu0 %vm15_vm0, %v11_v2  ;;  %v372_v7 = vpack.i.bf16 %v100_v6, %v99_v5  ;;  %v101_v8 = vld [vmem:[%s452_s1 + $0x20] sm:$0xff]  ;;  %v102_v9 = vld [vmem:[%s452_s1 + $0x28] sm:$0xff]  ;;  %v207_v25 = vld [vmem:[%s452_s1 + $0x30] sm:$0xff] }
   0x4   :  { %352 = vmatprep.subr.bf16.mxu0 %v351_v3  ;;  %v377_v10 = vpack.i.bf16 %v102_v9, %v101_v8  ;;  %v208_v26 = vld [vmem:[%s452_s1 + $0x38] sm:$0xff]  ;;  %v209_v27 = vld [vmem:[%s452_s1 + $0x40] sm:$0xff]  ;;  %v210_v29 = vld [vmem:[%s452_s1 + $0x48] sm:$0xff] }
   0x5   :  { %354 = vmatpush3.bf16.msra.mxu0 %v351_v3  ;;  %373 = vrot.lane.b32.xlu0 %v372_v7, %s390_s25  ;;  %v363_v28 = vpack.c.bf16 %v208_v26, %v207_v25  ;;  %v367_v30 = vpack.c.bf16 %v210_v29, %v209_v27 }
   0x7   :  { %364 = vmatprep.subr.bf16.mxu0 %v363_v28 }
   0x8   :  { %327 = vmatmul.mubr.msk.f32.vlgmr.msra.gmra.mrb[0].mxu0 %vm15_vm0, %v12_v4 }
   0x9   :  { %378 = vrot.lane.b32.xlu0 %v377_v10, %s390_s25  ;;  %366 = vmatpush3.bf16.msra.mxu0 %v363_v28 }
   0xa   :  { %368 = vmatprep.subr.bf16.mxu0 %v367_v30 }
   0xd   :  { %370 = vmatpush3.bf16.msra.mxu0 %v367_v30 }
  0x77   :  { %v374_v11 = vpop.permute.xlu0 %373 }
  0x78   :  { %v376_v12 = vunpack.i.h.bf16 %v374_v11  ;;  %v375_v13 = vunpack.i.l.bf16 %v374_v11 }
  0x7a   :  { %v355_v14 = vpack.c.bf16 %v376_v12, %v375_v13 }
  0x7b   :  { %v379_v15 = vpop.permute.xlu0 %378 }
  0x7c   :  { %v381_v16 = vunpack.i.h.bf16 %v379_v15  ;;  %v380_v17 = vunpack.i.l.bf16 %v379_v15  ;;  %356 = vmatprep.subr.bf16.mxu1 %v355_v14 }
  0x7d   :  { %358 = vmatpush3.bf16.msra.mxu1 %v355_v14 }
  0x7e   :  { %v359_v18 = vpack.c.bf16 %v381_v16, %v380_v17 }
  0x80   :  { %360 = vmatprep.subr.bf16.mxu1 %v359_v18 }
  0x81   :  { %362 = vmatpush3.bf16.msra.mxu1 %v359_v18 }
  0xdb   :  { %v328_v19 = vpop.f32.mrb[0].mxu0 }
  0xdc   :  { %v88_v20 = vpop.f32.mrb[1].mxu0 }
  0xdd   :  { %382 = vtanh.f32 %v88_v20 }
  0xde   :  { %384 = vtanh.f32 %v328_v19 }
  0xe7   :  { %v383_v21 = vpop.eup %382 }
  0xe8   :  { %105 = vrot.lane.b32.xlu1 %v383_v21, %s390_s25  ;;  %v385_v22 = vpop.eup %384 }
  0xec   :  { %107 = vrot.lane.b32.xlu1 %v385_v22, %s390_s25 }
 0x15a   :  { %v106_v23 = vpop.permute.xlu1 %105 }
 0x15b   :  { %337 = vmatprep.mubr.msk.f32.mxu1 %vm125_vm1, %v106_v23 }
 0x15e   :  { %v108_v24 = vpop.permute.xlu1 %107 }
 0x15f   :  { %338 = vmatmul.mubr.msk.f32.vlgmr.msra.gmra.mrb[0].mxu1 %vm125_vm1, %v108_v24 }
 0x232   :  { %v339_v31 = vpop.f32.mrb[0].mxu1 }
 0x233   :  { %v196_v32 = vpop.f32.mrb[1].mxu1 }
 0x234   :  { %386 = vtanh.f32 %v196_v32 }
 0x235   :  { %388 = vtanh.f32 %v339_v31 }
 0x23e   :  { %v387_v33 = vpop.eup %386 }
 0x23f   :  { %v389_v34 = vpop.eup %388  ;;  %348 = vmatprep.mubr.msk.f32.mxu0 %vm125_vm1, %v387_v33 }
 0x240   :  { %349 = vmatmul.mubr.msk.f32.vlgmr.msra.gmra.mrb[2].mxu0 %vm125_vm1, %v389_v34 }
 0x313   :  { %v350_v35 = vpop.f32.mrb[2].mxu0 }
 0x314   :  { %v293_v36 = vadd.f32 %v350_v35, %v328_v19  ;;  %v283_v37 = vpop.f32.mrb[3].mxu0 }
 0x315   :  { %v292_v38 = vadd.f32 %v283_v37, %v88_v20 }
 0x316   :  { %295 = vst [vmem:[%s454_s2 + $0x8] sm:$0xff] %v293_v36 }
 0x317   :  { %294 = vst [vmem:[%s454_s2] sm:$0xff] %v292_v38 }

</bundles_post_ra>
